<compile_context>
chip_gen: v7x
topology: tpu7x:2x2x1
jax: 0.10.0
libtpu: 0.0.40
codegen_flags: <defaults>
</compile_context>

<pallas_src>
import jax
import jax.numpy as jnp
from jax.experimental import pallas as pl
from jax.experimental.pallas import tpu as pltpu

NUM_FRAMES = 8     # Embedder.frame_dim
FEAT = 32          # per-frame feature dim of the synthetic wrapped model
HID = 64           # embedding dim of the synthetic wrapped model

# TPU-friendly padded sizes (last dims lane-dense = 128).
D_PAD = 128        # contraction axis: FEAT features + 1 bias column + zero pad
H_PAD = 128        # output lane axis: HID real columns + zero pad
TB_MAX = 128       # max batch rows per grid step (TB_MAX * NUM_FRAMES = 1024 MXU rows)


def _round_up(n, m):
    return (n + m - 1) // m * m


def embedder_kernel(x_ref, w_ref, o_ref):
    """x_ref: (TB*F, D_PAD) bf16, w_ref: (D_PAD, H_PAD) bf16 (bias folded in),
    o_ref: (TB, H_PAD) f32 (lane-dense, unmasked stores)."""
    # Per-frame linear layer (+ bias via the folded ones-column) on the MXU.
    h = jnp.dot(x_ref[...], w_ref[...], preferred_element_type=jnp.float32)
    h = jnp.maximum(h, 0.0)                                  # ReLU, f32 VPU
    # Temporal mean-pool. (TB*F,128)->(TB,8,128) is (8,128)-tile aligned
    # (F == 8 sublanes, lane == 128) so it is a layout no-op; the axis=1 sum is
    # a cross-sublane reduce (XLU), multiply by exact 1/8 on the VPU.
    tbf, hp = h.shape
    tb = tbf // NUM_FRAMES
    pooled = jnp.sum(h.reshape(tb, NUM_FRAMES, hp), axis=1) * (1.0 / NUM_FRAMES)
    # L2 normalize (padded output columns of `pooled` are exactly zero, so the
    # norm over 128 lanes equals the norm over the 64 real columns).
    inv = jax.lax.rsqrt(jnp.sum(pooled * pooled, axis=-1, keepdims=True) + 1e-12)
    o_ref[...] = (pooled * inv).astype(o_ref.dtype)


def truncated_input(x, num_frames):
    """truncatedinput(num_frames, truncate=True): clip (or zero-pad) frame axis."""
    B, C, F, D = x.shape
    if F >= num_frames:
        return x[:, :, :num_frames, :]
    return jnp.pad(x, ((0, 0), (0, 0), (0, num_frames - F), (0, 0)))


def _prepare_inputs(x, w, b, tb):
    """Transformer (truncate + squeeze) and TPU-friendly bf16 padded operands."""
    # TODO(synk): totensor/truncatedinput/`model` are external, undefined classes
    # in the reference; totensor(permute) is a no-op for float arrays already in
    # (B, 1, Frames, Feat) layout and the model is a synthetic embedding net.
    # TODO(synk): zero-padded frames still contribute relu(bias)/F to the pooled
    # mean (matches the reference here); mask them if short-clip fidelity matters.
    x = truncated_input(x, NUM_FRAMES)
    x = jnp.squeeze(x, axis=1)                               # (B, F, FEAT)
    B = x.shape[0]
    b_pad = _round_up(max(B, 1), tb)

    # Append a constant 1.0 feature so the bias rides the matmul, then zero-pad
    # the contraction axis to 128 lanes and flatten frames into rows (wrapper-
    # side, contiguous -> free). bf16 halves the dominant HBM->VMEM traffic.
    ones = jnp.ones((B, NUM_FRAMES, 1), x.dtype)
    x_aug = jnp.concatenate([x, ones], axis=-1)              # (B, F, FEAT+1)
    x_aug = jnp.pad(x_aug, ((0, b_pad - B), (0, 0), (0, D_PAD - FEAT - 1)))
    x_aug = x_aug.reshape(b_pad * NUM_FRAMES, D_PAD).astype(jnp.bfloat16)

    # Weight zero-padded to (128, 128) with the bias folded into row FEAT.
    w_aug = jnp.zeros((D_PAD, H_PAD), jnp.float32)
    w_aug = w_aug.at[:FEAT, :HID].set(w)
    w_aug = w_aug.at[FEAT, :HID].set(b)
    w_aug = w_aug.astype(jnp.bfloat16)
    return x_aug, w_aug, B, b_pad


def embedder_forward(x, w, b, *, block_batch=None):
    """Full Embedder.forward: transformer + model.forward (Pallas kernel)."""
    B = x.shape[0]
    tb = block_batch if block_batch is not None else min(TB_MAX, _round_up(B, 8))
    x_aug, w_aug, B, b_pad = _prepare_inputs(x, w, b, tb)

    out = pl.pallas_call(
        embedder_kernel,
        out_shape=jax.ShapeDtypeStruct((b_pad, H_PAD), jnp.float32),
        grid=(b_pad // tb,),
        in_specs=[
            pl.BlockSpec((tb * NUM_FRAMES, D_PAD), lambda i: (i, 0)),
            pl.BlockSpec((D_PAD, H_PAD), lambda i: (0, 0)),   # resident weights
        ],
        out_specs=pl.BlockSpec((tb, H_PAD), lambda i: (i, 0)),
        compiler_params=pltpu.CompilerParams(
            dimension_semantics=("parallel",)),   # shard batch blocks across TCs
    )(x_aug, w_aug)
    return out[:B, :HID]


def embedder_reference(x, w, b, *, block_batch=None):
    """Pure-JAX reference (same bf16 operands) for correctness checking."""
    B = x.shape[0]
    tb = block_batch if block_batch is not None else min(TB_MAX, _round_up(B, 8))
    x_aug, w_aug, B, b_pad = _prepare_inputs(x, w, b, tb)
    h = jnp.maximum(jnp.dot(x_aug, w_aug, preferred_element_type=jnp.float32), 0.0)
    pooled = h.reshape(b_pad, NUM_FRAMES, H_PAD).sum(axis=1) / NUM_FRAMES
    inv = jax.lax.rsqrt(jnp.sum(pooled * pooled, -1, keepdims=True) + 1e-12)
    return (pooled * inv)[:B, :HID]


if __name__ == "__main__":
    key = jax.random.PRNGKey(0)
    kx, kw, kb = jax.random.split(key, 3)

    # Input: (Batch Size x 1 x Frames x Features); Frames=12 > NUM_FRAMES=8
    # exercises the truncation path of the transformer.
    x = jax.random.normal(kx, (16, 1, 12, FEAT), dtype=jnp.float32)

    # Deterministic synthetic model parameters.
    w = jax.random.normal(kw, (FEAT, HID), dtype=jnp.float32) * 0.05
    b = jax.random.normal(kb, (HID,), dtype=jnp.float32) * 0.01

    # block_batch=8 -> grid=(2,): exercises the batch-tiled / pipelined path.
    out = jax.block_until_ready(embedder_forward(x, w, b, block_batch=8))
    ref = jax.block_until_ready(embedder_reference(x, w, b, block_batch=8))

    assert out.shape == (16, HID), out.shape
    assert jnp.allclose(out, ref, atol=2e-5, rtol=1e-4), float(
        jnp.max(jnp.abs(out - ref)))
    print("KERNEL_OK")
</pallas_src>

<mosaic_0001>
module attributes {stable_mosaic.version = 11 : i64} {
  func.func @embedder_kernel(%arg0: i32, %arg1: memref<64x128xbf16, #tpu.memory_space<vmem>>, %arg2: memref<128x128xbf16, #tpu.memory_space<vmem>>, %arg3: memref<8x128xf32, #tpu.memory_space<vmem>>) attributes {dimension_semantics = [#tpu.dimension_semantics<parallel>], iteration_bounds = array<i64: 2>, scalar_prefetch = 0 : i64, scratch_operands = 0 : i64, tpu.core_type = #tpu.core_type<tc>, window_params = [{transform_indices = @transform_0, window_bounds = array<i64: 64, 128>}, {pipeline_mode = #tpu.pipeline_mode<synchronous>, transform_indices = @transform_1, window_bounds = array<i64: 128, 128>}, {transform_indices = @transform_2, window_bounds = array<i64: 8, 128>}]} {
    %c0 = arith.constant 0 : index
    %c0_0 = arith.constant 0 : index
    %0 = vector.load %arg1[%c0, %c0_0] : memref<64x128xbf16, #tpu.memory_space<vmem>>, vector<64x128xbf16>
    %c0_1 = arith.constant 0 : index
    %c0_2 = arith.constant 0 : index
    %1 = vector.load %arg2[%c0_1, %c0_2] : memref<128x128xbf16, #tpu.memory_space<vmem>>, vector<128x128xbf16>
    %cst = arith.constant dense<0.000000e+00> : vector<64x128xf32>
    %2 = tpu.matmul %0, %1, %cst {dimension_numbers = #tpu.dot_dimension_numbers<[1], [0], [0], [1], [0, 0, 1, 1], [], []>} : vector<64x128xbf16>, vector<128x128xbf16>, vector<64x128xf32> -> vector<64x128xf32>
    %cst_3 = arith.constant 0.000000e+00 : f32
    %3 = vector.broadcast %cst_3 : f32 to vector<64x128xf32>
    %4 = arith.maximumf %2, %3 : vector<64x128xf32>
    %5 = vector.shape_cast %4 : vector<64x128xf32> to vector<8x8x128xf32>
    %cst_4 = arith.constant dense<0.000000e+00> : vector<8x128xf32>
    %6 = vector.multi_reduction <add>, %5, %cst_4 [1] : vector<8x8x128xf32> to vector<8x128xf32>
    %cst_5 = arith.constant 1.250000e-01 : f32
    %7 = vector.broadcast %cst_5 : f32 to vector<8x128xf32>
    %8 = arith.mulf %6, %7 : vector<8x128xf32>
    %9 = arith.mulf %8, %8 : vector<8x128xf32>
    %cst_6 = arith.constant dense<0.000000e+00> : vector<8xf32>
    %10 = vector.multi_reduction <add>, %9, %cst_6 [1] : vector<8x128xf32> to vector<8xf32>
    %11 = vector.shape_cast %10 : vector<8xf32> to vector<8x1xf32>
    %cst_7 = arith.constant 9.99999996E-13 : f32
    %12 = vector.broadcast %cst_7 : f32 to vector<8x1xf32>
    %13 = arith.addf %11, %12 : vector<8x1xf32>
    %14 = math.rsqrt %13 : vector<8x1xf32>
    %15 = vector.broadcast %14 : vector<8x1xf32> to vector<8x128xf32>
    %16 = arith.mulf %8, %15 : vector<8x128xf32>
    %c0_8 = arith.constant 0 : index
    %c0_9 = arith.constant 0 : index
    %17 = vector.load %arg3[%c0_8, %c0_9] : memref<8x128xf32, #tpu.memory_space<vmem>>, vector<8x128xf32>
    tpu.vector_store %arg3[%c0_8, %c0_9], %16 {strides = array<i32>} : memref<8x128xf32, #tpu.memory_space<vmem>>, vector<8x128xf32>,
    return
  }
  func.func @transform_0(%arg0: i32) -> (i32, i32) {
    %c0_i32 = arith.constant 0 : i32
    %c0_i32_0 = arith.constant 0 : i32
    return %arg0, %c0_i32 : i32, i32
  }
  func.func @transform_1(%arg0: i32) -> (i32, i32) {
    %c0_i32 = arith.constant 0 : i32
    %c0_i32_0 = arith.constant 0 : i32
    %c0_i32_1 = arith.constant 0 : i32
    return %c0_i32, %c0_i32_0 : i32, i32
  }
  func.func @transform_2(%arg0: i32) -> (i32, i32) {
    %c0_i32 = arith.constant 0 : i32
    %c0_i32_0 = arith.constant 0 : i32
    return %arg0, %c0_i32 : i32, i32
  }
}

</mosaic_0001>

<bundles_post_ra>
// kernel: tpu_custom_call.1
= control target key start
LH: loop header
LB: loop body
LE: loop exit
PB: predicated region body
PF: predicated region fallthrough
CT: control target
= control target key end

     0   :  { %7 = vsyncpa [#allocation3], 0  ;;  %s1110_s0 = inlined_call_operand.hbm [shape: bf16[128,128], index: 0, kind: input, shape index: {}]   ;;  %s1111_s1 = inlined_call_operand.hbm [shape: bf16[128,128], index: 1, kind: input, shape index: {}]   ;;  %s1112_s2 = inlined_call_operand.hbm [shape: f32[16,128], index: 2, kind: output, shape index: {}]  }
   0x1   :  { %9 = vsyncpa [#allocation3 + $0x1], 0 }
   0x2   :  { %10 = vsyncpa [#allocation6], 0 }
   0x3   :  { %11 = vsyncpa [#allocation4], 0 }
   0x4   :  { %13 = vsyncpa [#allocation4 + $0x1], 0  ;;  %s884_s9 = smov 0   ;;  %s886_s10 = smov 0  }
   0x5   :  { %s888_s11 = smov 0   ;;  %s890_s12 = smov 0  }
   0x6 LB: > { %s905_s13 = sadd.s32 4294967295, %s862_s12   ;;  %s581_s14 = sadd.s32 4294967294, %s862_s12   ;;  %s862_s12 = sphi %s890_s12, %s1132_s12   ;;  %s858_s11 = sphi %s888_s11, %s1131_s11   ;;  %s854_s10 = sphi %s886_s10, %s1130_s10   ;;  %s850_s9 = sphi %s884_s9, %s1129_s9  }
   0x7   : > { %p39_p0 = scmp.ne.s32.totalorder %s854_s10, %s850_s9  ;;  %p1113_p1 = scmp.eq.s32.totalorder %s905_s13, 0 }
   0x8   : > { %p90_p3 = scmp.eq.s32.totalorder %s581_s14, 1  ;;  %p582_p5 = scmp.ge.s32.totalorder %s862_s12, 1 }
   0x9   : > { %p914_p4 = por %p1113_p1, %p39_p0  ;;  %p97_p7 = scmp.lt.s32.totalorder %s862_s12, 3 }
   0xa   : > { %p919_p6 = por %p90_p3, %p39_p0  ;;  %s864_s18 = smov [#allocation5]  }
   0xb   : > { %s1116_s15 = scalar_select %p914_p4, 1, 0 }
   0xc   : > { %s1117_s16 = scalar_select %p919_p6, 1, 0 }
   0xd   : > { %p924_p8 = pnand %p582_p5, %p97_p7  ;;  %s109_s19 = sshll.u32 %s864_s18, 4  ;;  %s928_s19 = int_to_ptr.vmem [resolvable:$true] %s109_s19 }
   0xe   : > { %s940_s21 = sadd.s32 1, %s862_s12   ;;  %s26_s22 = sadd.s32 1, %s858_s11 }
   0xf   : > { %s1118_s17 = scalar_select %p924_p8, 1, 0 }
  0x10   : > { %p669_p9 = pneg %p924_p8  ;;  %s23_s23 = ssub.s32 %s862_s12, %s940_s21 }
  0x11   : > { %s734_s26 = scalar_lea.hbm %s1111_s1, 1024 }
  0x12   : > { %p935_p11 = pnand %p669_p9, %p1113_p1  ;;  %p735_p12 = scmp.ne.s32.totalorder %s1111_s1, %s734_s26 }
  0x13   : > { %p741_p5 = scmp.lt.u32.totalorder %s734_s26, %s1111_s1 }
  0x14   : > { %p736_p13 = pneg %p935_p11 }
  0x16   : > { %p737_p0 = pnand %p736_p13, %p735_p12 }
  0x18   : > { %p738_p3 = pneg %p737_p0 }
  0x1a   : > { %p743_p7 = pnand %p741_p5, %p738_p3 }
  0x1c   : > { %746 = shalt.err (!%p743_p7)
}
  0x1d   : > { %s747_s3 = scalar_lea.vmem %s928_s19, 1024  ;;  %p755_p2 = scmp.lt.s32.totalorder %s928_s19, %s928_s19 }
  0x1e   : > { %p748_p9 = scmp.ne.s32.totalorder %s928_s19, %s747_s3  ;;  %p756_p6 = scmp.lt.s32.totalorder %s747_s3, %s747_s3 }
  0x20   : > { %p750_p10 = pnand %p748_p9, %p736_p13  ;;  %p757_p4 = por %p756_p6, %p755_p2 }
  0x22   : > { %p751_p1 = pneg %p750_p10 }
  0x24   : > { %p758_p8 = pnand %p757_p4, %p751_p1 }
  0x26   : > { %761 = shalt.err (!%p758_p8)
}
  0x27   : > { %s865_s4 = smov 64   ;;  %s866_s5 = smov 4  }
  0x28   : > { %672 = dma.hbm_to_vmem [thread:$0]  (!%p935_p11), %s1111_s1, 1024, %s928_s19, [#allocation6], %s865_s4, %s865_s4, %s866_s5  }
  0x29   : > { %p24_p1 = scmp.eq.s32.totalorder %s23_s23, 0  ;;  %p33_p2 = scmp.ne.s32.totalorder %s858_s11, %s854_s10 }
  0x2a   : > { %p34_p4 = scmp.eq.s32.totalorder %s862_s12, 0  ;;  %p682_p6 = scmp.lt.s32.totalorder %s862_s12, 2 }
  0x2b   : > { %s974_s8 = scalar_select %p24_p1, %s858_s11, %s26_s22  }
  0x2c   : > { %p35_p8 = por %p34_p4, %p33_p2  ;;  %p1120_p10 = scmp.eq.s32.totalorder %s905_s13, 1 }
  0x2d   : > { %s123_s18 = sand.u32 1, %s858_s11   ;;  %s608_s20 = sshll.u32 %s862_s12, 9 }
  0x2e   : > { %p978_p12 = por %p1120_p10, %p33_p2  ;;  %s585_s24 = sshll.u32 %s123_s18, 5 }
  0x2f   : > { %s987_s27 = scalar_lea.hbm %s1110_s0, %s608_s20  ;;  %s127_s19 = scalar_lea.vmem [#allocation2], %s585_s24 }
  0x30   : > { %s134_s22 = sshll.u32 %s127_s19, 4  ;;  %p989_p11 = pnand %p682_p6, %p35_p8  ;;  %s993_s22 = int_to_ptr.vmem [resolvable:$true] %s134_s22 }
  0x31   : > { %s995_s28 = scalar_lea.sflag [#allocation3], %s123_s18  ;;  %s762_s29 = scalar_lea.hbm %s987_s27, 512 }
  0x32   : > { %p763_p13 = scmp.ne.s32.totalorder %s987_s27, %s762_s29  ;;  %p764_p0 = pneg %p989_p11 }
  0x33   : > { %s767_s6 = scalar_lea.hbm %s1110_s0, 1024  ;;  %p768_p7 = scmp.lt.u32.totalorder %s987_s27, %s1110_s0 }
  0x34   : > { %p765_p3 = pnand %p764_p0, %p763_p13  ;;  %p769_p9 = scmp.lt.u32.totalorder %s767_s6, %s762_s29 }
  0x35   : > { %p771_p2 = scmp.lt.u32.totalorder %s762_s29, %s987_s27 }
  0x36   : > { %p766_p5 = pneg %p765_p3  ;;  %p770_p1 = por %p769_p9, %p768_p7 }
  0x38   : > { %p772_p4 = por %p771_p2, %p770_p1 }
  0x3a   : > { %p773_p6 = pnand %p772_p4, %p766_p5 }
  0x3c   : > { %776 = shalt.err (!%p773_p6)
}
  0x3d   : > { %s777_s18 = scalar_lea.vmem %s993_s22, 512  ;;  %s867_s24 = smov [#allocation2]  }
  0x3e   : > { %p778_p8 = scmp.ne.s32.totalorder %s993_s22, %s777_s18  ;;  %s782_s25 = sshll.u32 %s867_s24, 4  ;;  %s783_s25 = int_to_ptr.vmem [resolvable:$false] %s782_s25 }
  0x3f   : > { %s784_s26 = scalar_lea.vmem %s783_s25, 1024  ;;  %p785_p3 = scmp.lt.s32.totalorder %s993_s22, %s783_s25 }
  0x40   : > { %p780_p10 = pnand %p778_p8, %p764_p0  ;;  %p786_p7 = scmp.lt.s32.totalorder %s784_s26, %s777_s18 }
  0x42   : > { %p781_p13 = pneg %p780_p10  ;;  %p787_p9 = por %p786_p7, %p785_p3 }
  0x44   : > { %p788_p1 = pnand %p787_p9, %p781_p13 }
  0x46   : > { %791 = shalt.err (!%p788_p1)
}
  0x47   : > { %676 = dma.hbm_to_vmem [thread:$0]  (!%p989_p11), %s987_s27, 512, %s993_s22, %s995_s28, %s865_s4, %s865_s4, %s866_s5  }
  0x48   : > { %p1123_p0 = scmp.ne.s32.totalorder %s1118_s17, 0 }
  0x49   : > { %s1029_s19 = sand.u32 (!%p1123_p0), 1, %s854_s10   ;;  %p1124_p5 = scmp.ne.s32.totalorder (!%p1123_p0), %s1116_s15, 0 }
  0x4a   : > { %146 = sbr.rel (%p1123_p0) target bundleno = 540 (0x21c), region = 28  ;;  %s589_s29 = sshll.u32 (!%p1123_p0), %s1029_s19, 5 }
  0x4b   : > { %s149_s30 = scalar_lea.sflag (!%p1123_p0), [#allocation3], %s1029_s19  ;;  %s1033_s3 = scalar_lea.vmem (!%p1123_p0), [#allocation2], %s589_s29 }
  0x51   : > { %837 = dma.done.wait (%p1124_p5), %s149_s30, 512  }
  0x52   : > { %839 = vsyncadd (%p1124_p5), %s149_s30, 4294966784  ;;  %p1125_p11 = scmp.eq.s32.totalorder %s905_s13, 0 }
  0x54   : > { %841 = dma.done.wait (%p1125_p11), [#allocation6], 1024   ;;  %p1126_p2 = pmov %p1125_p11 }
  0x55   : > { %v720_v0 = vld [vmem:[#allocation5] sm:$0xff]   ;;  %v721_v1 = vld [vmem:[#allocation5 + $0x8] sm:$0xff]   ;;  %v722_v2 = vld [vmem:[#allocation5 + $0x10] sm:$0xff]   ;;  %vm420_vm0 = vcmask 1041409   ;;  %vm422_vm1 = vcmask 1042434   ;;  %vm424_vm2 = vcmask 1043459  }
  0x56   : > { %843 = vsyncadd (%p1126_p2), [#allocation6], 4294966272  ;;  %621 = vmatprep.subr.bf16.mxu0 %v720_v0  ;;  %645 = vmatprep.subr.bf16.mxu1 %v720_v0  ;;  %v723_v3 = vld [vmem:[#allocation5 + $0x18] sm:$0xff]   ;;  %v728_v4 = vld [vmem:[%s1033_s3] sm:$0xff]   ;;  %vm426_vm3 = vcmask 1044484   ;;  %vm428_vm4 = vcmask 1045509  }
  0x57   : > { %622 = vmatpush3.bf16.msra.mxu0 %v720_v0  ;;  %653 = vmatpush3.bf16.msra.mxu1 %v720_v0  ;;  %v729_v5 = vld [vmem:[%s1033_s3 + $0x10] sm:$0xff]   ;;  %v724_v6 = vld [vmem:[#allocation5 + $0x20] sm:$0xff]   ;;  %v725_v7 = vld [vmem:[#allocation5 + $0x28] sm:$0xff]   ;;  %vm430_vm5 = vcmask 1046534   ;;  %vm432_vm6 = vcmask 1047559   ;;  %s591_s15 = sshll.u32 %s1029_s19, 3 }
  0x58   : > { %623 = vmatprep.subr.bf16.mxu0 %v721_v1  ;;  %646 = vmatprep.subr.bf16.mxu1 %v721_v1  ;;  %v726_v8 = vld [vmem:[#allocation5 + $0x30] sm:$0xff]   ;;  %v727_v9 = vld [vmem:[#allocation5 + $0x38] sm:$0xff]   ;;  %v730_v10 = vld [vmem:[%s1033_s3 + $0x8] sm:$0xff]   ;;  %s605_s17 = sshll.u32 %s905_s13, 7  ;;  %s176_s4 = scalar_lea.vmem [#allocation7], %s591_s15 }
  0x59   : > { %637 = vmatprep.mubr.bf16.mxu0 %v728_v4  ;;  %641 = vmatprep.mubr.bf16.mxu1 %v729_v5  ;;  %v731_v11 = vld [vmem:[%s1033_s3 + $0x18] sm:$0xff]   ;;  %s501_s5 = sshll.u32 %s176_s4, 4  ;;  %s1065_s23 = scalar_lea.hbm %s1112_s2, %s605_s17  ;;  %s1067_s5 = int_to_ptr.vmem [resolvable:$true] %s501_s5 }
  0x5a   : > { %s488_s13 = scalar_lea.sflag [#allocation4], %s1029_s19  ;;  %s792_s28 = scalar_lea.vmem %s1067_s5, 128 }
  0x5b   : > { %624 = vmatpush3.bf16.msra.mxu0 %v721_v1  ;;  %654 = vmatpush3.bf16.msra.mxu1 %v721_v1  ;;  %p793_p4 = scmp.ne.s32.totalorder %s1067_s5, %s792_s28  ;;  %s868_s6 = smov [#allocation7]  }
  0x5c   : > { %625 = vmatprep.subr.bf16.mxu0 %v722_v2  ;;  %647 = vmatprep.subr.bf16.mxu1 %v722_v2  ;;  %s796_s7 = sshll.u32 %s868_s6, 4  ;;  %s797_s7 = int_to_ptr.vmem [resolvable:$false] %s796_s7 }
  0x5d   : > { %p794_p6 = pnand %p793_p4, %p978_p12  ;;  %s798_s20 = scalar_lea.vmem %s797_s7, 256 }
  0x5e   : > { %p799_p10 = scmp.lt.s32.totalorder %s1067_s5, %s797_s7  ;;  %p800_p13 = scmp.lt.s32.totalorder %s798_s20, %s792_s28 }
  0x5f   : > { %626 = vmatpush3.bf16.msra.mxu0 %v722_v2  ;;  %655 = vmatpush3.bf16.msra.mxu1 %v722_v2  ;;  %p795_p8 = pneg %p794_p6 }
  0x60   : > { %627 = vmatprep.subr.bf16.mxu0 %v723_v3  ;;  %648 = vmatprep.subr.bf16.mxu1 %v723_v3  ;;  %p801_p3 = por %p800_p13, %p799_p10 }
  0x62   : > { %p802_p7 = pnand %p801_p3, %p795_p8 }
  0x63   : > { %628 = vmatpush3.bf16.msra.mxu0 %v723_v3  ;;  %656 = vmatpush3.bf16.msra.mxu1 %v723_v3 }
  0x64   : > { %629 = vmatprep.subr.bf16.mxu0 %v724_v6  ;;  %649 = vmatprep.subr.bf16.mxu1 %v724_v6 }
  0x67   : > { %630 = vmatpush3.bf16.msra.mxu0 %v724_v6  ;;  %657 = vmatpush3.bf16.msra.mxu1 %v724_v6 }
  0x68   : > { %631 = vmatprep.subr.bf16.mxu0 %v725_v7  ;;  %650 = vmatprep.subr.bf16.mxu1 %v725_v7 }
  0x6b   : > { %632 = vmatpush3.bf16.msra.mxu0 %v725_v7  ;;  %658 = vmatpush3.bf16.msra.mxu1 %v725_v7 }
  0x6c   : > { %633 = vmatprep.subr.bf16.mxu0 %v726_v8  ;;  %651 = vmatprep.subr.bf16.mxu1 %v726_v8 }
  0x6f   : > { %634 = vmatpush3.bf16.msra.mxu0 %v726_v8  ;;  %659 = vmatpush3.bf16.msra.mxu1 %v726_v8 }
  0x70   : > { %635 = vmatprep.subr.bf16.mxu0 %v727_v9  ;;  %652 = vmatprep.subr.bf16.mxu1 %v727_v9 }
  0x73   : > { %636 = vmatpush3.bf16.msra.mxu0 %v727_v9  ;;  %660 = vmatpush3.bf16.msra.mxu1 %v727_v9 }
  0x76   : > { %638 = vmatmul.mubr.bf16.vlgmr.msra.gmra.mrb[0].mxu0 %v730_v10  ;;  %642 = vmatmul.mubr.bf16.vlgmr.msra.gmra.mrb[0].mxu1 %v731_v11 }
 0x149   : > { %v639_v12 = vpop.f32.mrb[0].mxu0  ;;  %v643_v13 = vpop.f32.mrb[0].mxu1 }
 0x14a   : > { %v342_v14 = vmax.f32 %v639_v12, 0.0  ;;  %v346_v15 = vmax.f32 %v643_v13, 0.0  ;;  %v309_v16 = vpop.f32.mrb[1].mxu0  ;;  %v325_v17 = vpop.f32.mrb[1].mxu1 }
 0x14b   : > { %v340_v18 = vmax.f32 %v309_v16, 0.0  ;;  %v344_v19 = vmax.f32 %v325_v17, 0.0  ;;  %v640_v20 = vpop.f32.mrb[2].mxu0  ;;  %v644_v21 = vpop.f32.mrb[2].mxu1 }
 0x14c   : > { %v360_v22 = vrot.slane %v342_v14, 4  ;;  %v384_v23 = vrot.slane %v346_v15, 4  ;;  %v343_v24 = vmax.f32 %v640_v20, 0.0  ;;  %v347_v25 = vmax.f32 %v644_v21, 0.0  ;;  %v312_v26 = vpop.f32.mrb[3].mxu0  ;;  %v328_v27 = vpop.f32.mrb[3].mxu1 }
 0x14d   : > { %v348_v28 = vrot.slane %v340_v18, 4  ;;  %v372_v29 = vrot.slane %v344_v19, 4  ;;  %v341_v30 = vmax.f32 %v312_v26, 0.0  ;;  %v345_v31 = vmax.f32 %v328_v27, 0.0 }
 0x14e   : > { %v361_v32 = vadd.f32 %v360_v22, %v342_v14  ;;  %v385_v33 = vadd.f32 %v384_v23, %v346_v15  ;;  %v366_v34 = vrot.slane %v343_v24, 4  ;;  %v390_v35 = vrot.slane %v347_v25, 4 }
 0x14f   : > { %v349_v36 = vadd.f32 %v348_v28, %v340_v18  ;;  %v373_v37 = vadd.f32 %v372_v29, %v344_v19  ;;  %v354_v38 = vrot.slane %v341_v30, 4  ;;  %v378_v39 = vrot.slane %v345_v31, 4 }
 0x150   : > { %v362_v40 = vrot.slane %v361_v32, 2  ;;  %v386_v41 = vrot.slane %v385_v33, 2  ;;  %v367_v42 = vadd.f32 %v366_v34, %v343_v24  ;;  %v391_v43 = vadd.f32 %v390_v35, %v347_v25 }
 0x151   : > { %v350_v44 = vrot.slane %v349_v36, 2  ;;  %v374_v45 = vrot.slane %v373_v37, 2  ;;  %v355_v46 = vadd.f32 %v354_v38, %v341_v30  ;;  %v379_v47 = vadd.f32 %v378_v39, %v345_v31 }
 0x152   : > { %v363_v48 = vadd.f32 %v362_v40, %v361_v32  ;;  %v387_v49 = vadd.f32 %v386_v41, %v385_v33  ;;  %v368_v50 = vrot.slane %v367_v42, 2  ;;  %v392_v51 = vrot.slane %v391_v43, 2 }
 0x153   : > { %v351_v52 = vadd.f32 %v350_v44, %v349_v36  ;;  %v375_v53 = vadd.f32 %v374_v45, %v373_v37  ;;  %v356_v54 = vrot.slane %v355_v46, 2  ;;  %v380_v55 = vrot.slane %v379_v47, 2 }
 0x154   : > { %v364_v56 = vrot.slane %v363_v48, 1  ;;  %v369_v57 = vadd.f32 %v368_v50, %v367_v42  ;;  %v393_v58 = vadd.f32 %v392_v51, %v391_v43  ;;  %v388_v0 = vrot.slane %v387_v49, 1 }
 0x155   : > { %v352_v59 = vrot.slane %v351_v52, 1  ;;  %v376_v60 = vrot.slane %v375_v53, 1  ;;  %v357_v61 = vadd.f32 %v356_v54, %v355_v46  ;;  %v381_v62 = vadd.f32 %v380_v55, %v379_v47 }
 0x156   : > { %v365_v63 = vadd.f32 %v364_v56, %v363_v48  ;;  %v370_v1 = vrot.slane %v369_v57, 1  ;;  %v394_v3 = vrot.slane %v393_v58, 1  ;;  %v389_v12 = vadd.f32 %v388_v0, %v387_v49 }
 0x157   : > { %v353_v2 = vadd.f32 %v352_v59, %v351_v52  ;;  %v358_v4 = vrot.slane %v357_v61, 1  ;;  %v382_v5 = vrot.slane %v381_v62, 1  ;;  %v377_v6 = vadd.f32 %v376_v60, %v375_v53 }
 0x158   : > { %v371_v7 = vadd.f32 %v370_v1, %v369_v57  ;;  %v398_v11 = vmul.f32 0.125, %v365_v63  ;;  %v395_v14 = vadd.f32 %v394_v3, %v393_v58  ;;  %v402_v21 = vmul.f32 0.125, %v389_v12 }
 0x159   : > { %v396_v8 = vmul.f32 0.125, %v353_v2  ;;  %v359_v9 = vadd.f32 %v358_v4, %v357_v61  ;;  %v383_v10 = vadd.f32 %v382_v5, %v381_v62  ;;  %v400_v16 = vmul.f32 0.125, %v377_v6 }
 0x15a   : > { %v399_v13 = vmul.f32 0.125, %v371_v7  ;;  %v406_v20 = vmul.f32 %v398_v11, %v398_v11  ;;  %v403_v24 = vmul.f32 0.125, %v395_v14  ;;  %v410_v29 = vmul.f32 %v402_v21, %v402_v21 }
 0x15b   : > { %v397_v15 = vmul.f32 0.125, %v359_v9  ;;  %v404_v17 = vmul.f32 %v396_v8, %v396_v8  ;;  %v401_v19 = vmul.f32 0.125, %v383_v10  ;;  %v408_v25 = vmul.f32 %v400_v16, %v400_v16 }
 0x15c   : > { %v407_v22 = vmul.f32 %v399_v13, %v399_v13  ;;  %v411_v31 = vmul.f32 %v403_v24, %v403_v24 }
 0x15d   : > { %v405_v18 = vmul.f32 %v397_v15, %v397_v15  ;;  %v409_v27 = vmul.f32 %v401_v19, %v401_v19 }
 0x15f   : > { %v421_v23 = vsel %vm420_vm0, %v405_v18, %v404_v17 }
 0x160   : > { %v423_v26 = vsel %vm422_vm1, %v406_v20, %v421_v23 }
 0x161   : > { %v425_v28 = vsel %vm424_vm2, %v407_v22, %v423_v26 }
 0x162   : > { %v427_v30 = vsel %vm426_vm3, %v408_v25, %v425_v28 }
 0x163   : > { %v429_v32 = vsel %vm428_vm4, %v409_v27, %v427_v30 }
 0x164   : > { %v431_v33 = vsel %vm430_vm5, %v410_v29, %v429_v32 }
 0x165   : > { %v433_v34 = vsel %vm432_vm6, %v411_v31, %v431_v33 }
 0x166   : > { %435 = vadd.xlane.f32.xlu0 %v433_v34 }
 0x1f3   : > { %v436_v35 = vpop.xlane.xlu0 %435 }
 0x1f4   : > { %v437_v36 = vadd.f32 1e-12, %v436_v35 }
 0x1f6   : > { %732 = vrsqrt.f32 %v437_v36 }
 0x200   : > { %v733_v37 = vpop.eup %732 }
 0x201   : > { %v440_v38 = vrot.slane %v733_v37, 1  ;;  %v441_v39 = vrot.slane %v733_v37, 2  ;;  %v442_v40 = vrot.slane %v733_v37, 3  ;;  %v443_v41 = vrot.slane %v733_v37, 4 }
 0x202   : > { %v444_v42 = vrot.slane %v733_v37, 5  ;;  %v445_v43 = vrot.slane %v733_v37, 6  ;;  %v446_v44 = vrot.slane %v733_v37, 7  ;;  %v455_v49 = vmul.f32 %v733_v37, %v396_v8 }
 0x203   : > { %v456_v45 = vmul.f32 %v440_v38, %v397_v15  ;;  %v457_v46 = vmul.f32 %v441_v39, %v398_v11  ;;  %v458_v47 = vmul.f32 %v442_v40, %v399_v13  ;;  %v459_v48 = vmul.f32 %v443_v41, %v400_v16 }
 0x204   : > { %v460_v50 = vmul.f32 %v444_v42, %v401_v19  ;;  %v461_v53 = vmul.f32 %v445_v43, %v402_v21  ;;  %v462_v54 = vmul.f32 %v446_v44, %v403_v24 }
 0x205   : > { %v471_v51 = vrot.slane %v456_v45, 7  ;;  %v473_v52 = vrot.slane %v457_v46, 6  ;;  %v475_v56 = vrot.slane %v458_v47, 5  ;;  %v477_v58 = vrot.slane %v459_v48, 4 }
 0x206   : > { %v479_v60 = vrot.slane %v460_v50, 3  ;;  %v481_v62 = vrot.slane %v461_v53, 2  ;;  %v483_v0 = vrot.slane %v462_v54, 1 }
 0x207   : > { %v472_v55 = vsel %vm420_vm0, %v471_v51, %v455_v49 }
 0x208   : > { %v474_v57 = vsel %vm422_vm1, %v473_v52, %v472_v55 }
 0x209   : > { %v476_v59 = vsel %vm424_vm2, %v475_v56, %v474_v57 }
 0x20a   : > { %v478_v61 = vsel %vm426_vm3, %v477_v58, %v476_v59 }
 0x20b   : > { %v480_v63 = vsel %vm428_vm4, %v479_v60, %v478_v61 }
 0x20c   : > { %v482_v1 = vsel %vm430_vm5, %v481_v62, %v480_v63 }
 0x20d   : > { %v484_v2 = vsel %vm432_vm6, %v483_v0, %v482_v1 }
 0x20e   : > { %486 = vst [vmem:[%s176_s4] sm:$0xff] %v484_v2 }
 0x20f   : > { %805 = shalt.err (!%p802_p7)
}
 0x210   : > { %s806_s18 = scalar_lea.hbm %s1065_s23, 128  ;;  %s810_s26 = scalar_lea.hbm %s1112_s2, 256 }
 0x211   : > { %p807_p9 = scmp.ne.s32.totalorder %s1065_s23, %s806_s18  ;;  %p811_p5 = scmp.lt.u32.totalorder %s1065_s23, %s1112_s2 }
 0x212   : > { %p812_p11 = scmp.lt.u32.totalorder %s810_s26, %s806_s18  ;;  %p814_p4 = scmp.lt.u32.totalorder %s806_s18, %s1065_s23 }
 0x213   : > { %p808_p1 = pnand %p807_p9, %p978_p12 }
 0x214   : > { %p813_p2 = por %p812_p11, %p811_p5 }
 0x215   : > { %p809_p0 = pneg %p808_p1 }
 0x216   : > { %p815_p6 = por %p814_p4, %p813_p2 }
 0x218   : > { %p816_p8 = pnand %p815_p6, %p809_p0 }
 0x21a   : > { %819 = shalt.err (!%p816_p8)
}
 0x21b   : > { %667 = dma.vmem_to_hbm [thread:$0]  (%p978_p12), %s1067_s5, 128, %s1065_s23, %s488_s13  }
 0x21c PF: > { %s513_s30 = sand.u32 1, %s850_s9   ;;  %p1127_p10 = scmp.ne.s32.totalorder %s1117_s16, 0 }
 0x21d   : > { %p1128_p13 = scmp.ge.s32.totalorder %s862_s12, 2  ;;  %s514_s3 = scalar_lea.sflag [#allocation4], %s513_s30 }
 0x21f   : > { %p678_p3 = pnand %p1128_p13, %p1127_p10 }
 0x221   : > { %845 = dma.done.wait (!%p678_p3), %s514_s3, 128  }
 0x222   : > { %847 = vsyncadd (!%p678_p3), %s514_s3, 4294967168  ;;  %p16_p7 = scmp.ge.s32.totalorder %s940_s21, 4   ;;  %s1129_s9 = smov %s854_s10 }
 0x223   : > { %s1130_s10 = smov %s858_s11  ;;  %s1131_s11 = smov %s974_s8 }
 0x224   : > { %s1132_s12 = smov %s940_s21  ;;  %18 = sbr.rel (!%p16_p7) target bundleno = 6 (0x6), region = 77 }
 0x22b   :  { %519 = vsyncpa [#allocation3], 1 }
 0x22c   :  { %521 = vsyncpa [#allocation3 + $0x1], 1 }
 0x22d   :  { %522 = vsyncpa [#allocation6], 1 }
 0x22e   :  { %523 = vsyncpa [#allocation4], 1 }
 0x22f   :  { %525 = vsyncpa [#allocation4 + $0x1], 1 }

</bundles_post_ra>
